<compile_context>
chip_gen: v7x
topology: tpu7x:2x2x1
jax: 0.10.0
libtpu: 0.0.40
codegen_flags: <defaults>
</compile_context>

<pallas_src>
import math

import jax
import jax.numpy as jnp
from jax import lax
from jax.experimental import pallas as pl
from jax.experimental.pallas import tpu as pltpu


def _slice_conv_kernel(x_ref, w_ref, b_ref, o_ref):
    """One grid step = one batch row x one group of Gs slices.

    x_ref: (Gs, C_ph, TQ)    compute dtype   phase-split slice windows
    w_ref: (Kq, C_out, C_ph) compute dtype   phase-split weights (zero padded)
    b_ref: (C_out, 1)        float32
    o_ref: (C_out, Gs, TL)   output dtype
    """
    Gs = x_ref.shape[0]
    Kq = w_ref.shape[0]
    C_out = o_ref.shape[0]
    TL = o_ref.shape[2]
    bias = b_ref[...]                                     # (C_out, 1) -> bcast over TL
    for g in range(Gs):                                   # static unroll: slices in group
        xg = x_ref[g]                                     # (C_ph, TQ)
        acc = jnp.zeros((C_out, TL), jnp.float32)
        for q in range(Kq):                               # static unroll: tap groups
            acc = acc + jnp.dot(w_ref[q], xg[:, q:q + TL],
                                preferred_element_type=jnp.float32)
        res = (acc + bias).astype(o_ref.dtype)            # (C_out, TL)
        o_ref[:, g:g + 1, :] = res[:, None, :]


def slice_conv1d(x, w, b, *, stride, slice_size,
                 compute_dtype=jnp.bfloat16, out_dtype=None):
    """Exact re-implementation of SliceConv1d.forward as one fused Pallas call."""
    B, C_in, L = x.shape
    C_out, c_in_w, K = w.shape
    assert c_in_w == C_in, (c_in_w, C_in)
    out_dtype = x.dtype if out_dtype is None else out_dtype
    half = K // 2

    # ---- Static per-slice bookkeeping (mirrors SliceConv1d.forward exactly) ----
    S = int(math.ceil(L / slice_size))
    begins, louts = [], []
    for i in range(S):
        begin = i * slice_size
        begin = int(math.ceil(begin / stride)) * stride
        end = min(begin + slice_size + half, L)
        lout = (end - begin - K) // stride + 1
        if lout < 1:
            # torch.nn.Conv1d would also fail on an input shorter than the kernel.
            raise ValueError(f"slice {i} has length {end - begin} < kernel size {K}")
        begins.append(begin)
        louts.append(lout)

    TL = max(louts)                 # full-slice output length (all non-last slices)
    Kq = -(-K // stride)            # ceil(K / stride): tap groups per phase
    TQ = TL + Kq - 1                # phase-time columns needed per slice window
    C_ph = stride * C_in            # phase-split channel count

    cbytes = jnp.dtype(compute_dtype).itemsize
    obytes = jnp.dtype(out_dtype).itemsize

    # ---- Slice-group size Gs (second-minor dim of the output block) ----
    # Must be a multiple of the sublane tile (8 f32 / 16 bf16) or equal to S.
    gs_align = max(8, 32 // obytes)
    if S <= gs_align:
        Gs = S
    else:
        Gs = gs_align

        def _step_bytes(g):
            return g * (C_ph * TQ * cbytes + C_out * TL * obytes)

        # Grow per-step work, but keep >= 2 groups (v7x has 2 TensorCores) and
        # keep per-step blocks modest.
        while (Gs * 2 <= S and -(-S // (Gs * 2)) >= 2
               and _step_bytes(Gs * 2) <= (4 << 20)):
            Gs *= 2
    n_groups = -(-S // Gs)
    S_in = n_groups * Gs            # input slice-stack padded to a whole # of groups

    # ---- Phase-split, slice-stacked input (the only restaging copy, bf16) ----
    # x_sl[b, s, r*C_in + ci, u] = x[b, ci, begin_s + u*stride + r]
    win_len = TQ * stride
    pad_len = max(max(bg + win_len for bg in begins) - L, 0)
    x_pad = jnp.pad(x, ((0, 0), (0, 0), (0, pad_len)))
    begins_in = begins + [0] * (S_in - S)          # pad slices (results are dropped)
    wins = jnp.stack(
        [lax.slice_in_dim(x_pad, bg, bg + win_len, axis=2) for bg in begins_in],
        axis=1)                                    # (B, S_in, C_in, win_len)
    x_sl = wins.reshape(B, S_in, C_in, TQ, stride)
    x_sl = jnp.transpose(x_sl, (0, 1, 4, 2, 3)).reshape(B, S_in, C_ph, TQ)
    x_sl = x_sl.astype(compute_dtype)

    # ---- Phase-split weights: w_ph[q, co, r*C_in+ci] = w[co, ci, q*stride + r] ----
    w_pad = jnp.pad(w, ((0, 0), (0, 0), (0, Kq * stride - K)))
    w_ph = w_pad.reshape(C_out, C_in, Kq, stride)
    w_ph = jnp.transpose(w_ph, (2, 0, 3, 1)).reshape(Kq, C_out, C_ph)
    w_ph = w_ph.astype(compute_dtype)

    b_col = b.astype(jnp.float32).reshape(C_out, 1)

    # ---- VMEM budget derived from the actual blocks (cap below v7x's 64 MiB) ----
    in_block = Gs * C_ph * TQ * cbytes
    out_block = C_out * Gs * TL * obytes
    w_bytes = Kq * C_out * max(C_ph, 128) * cbytes      # lane padding
    b_bytes = C_out * 128 * 4
    block_bytes = 2 * (in_block + out_block) + w_bytes + b_bytes
    vmem_limit = int(min(48 << 20, max(32 << 20, 2 * block_bytes)))

    y4 = pl.pallas_call(
        _slice_conv_kernel,
        out_shape=jax.ShapeDtypeStruct((B, C_out, S, TL), out_dtype),
        grid=(B, n_groups),
        in_specs=[
            pl.BlockSpec((None, Gs, C_ph, TQ), lambda bi, gi: (bi, gi, 0, 0)),
            pl.BlockSpec((Kq, C_out, C_ph), lambda bi, gi: (0, 0, 0)),
            pl.BlockSpec((C_out, 1), lambda bi, gi: (0, 0)),
        ],
        out_specs=pl.BlockSpec((None, C_out, Gs, TL), lambda bi, gi: (bi, 0, gi, 0)),
        compiler_params=pltpu.CompilerParams(
            dimension_semantics=("parallel", "parallel"),
            vmem_limit_bytes=vmem_limit,
        ),
    )(x_sl, w_ph, b_col)

    # ---- Assemble the concatenated output ----
    # NOTE: columns >= louts[-1] of the last slice (and any padded slices) hold
    # garbage but lie outside the output array / are cut by the slice below, so
    # they are never observed.
    L_total = sum(louts)
    if all(l == TL for l in louts[:-1]):
        y = y4.reshape(B, C_out, S * TL)         # free reshape (row-major merge)
        if L_total != S * TL:
            y = y[:, :, :L_total]                # one output copy only when ragged
    else:
        # Rare: an interior slice was clipped by the end of the signal.
        y = jnp.concatenate([y4[:, :, i, :louts[i]] for i in range(S)], axis=-1)
    return y


def _reference_slice_conv1d(x, w, b, *, stride, slice_size,
                            compute_dtype=jnp.bfloat16):
    """Pure-JAX reference (lax conv per slice + concat), same numerics recipe."""
    _, _, L = x.shape
    _, _, K = w.shape
    half = K // 2
    num_slices = int(math.ceil(L / slice_size))
    outs = []
    for i in range(num_slices):
        begin = int(math.ceil((i * slice_size) / stride)) * stride
        end = min(begin + slice_size + half, L)
        y = lax.conv_general_dilated(
            x[:, :, begin:end].astype(compute_dtype), w.astype(compute_dtype),
            window_strides=(stride,), padding="VALID",
            dimension_numbers=("NCH", "OIH", "NCH"),
            preferred_element_type=jnp.float32)
        outs.append((y + b.astype(jnp.float32)[None, :, None]).astype(x.dtype))
    return jnp.concatenate(outs, axis=-1)


if __name__ == "__main__":
    root = jax.random.PRNGKey(0)

    def _make(key, B, C_in, C_out, K, L):
        k1, k2, k3 = jax.random.split(key, 3)
        bound = 1.0 / math.sqrt(C_in * K)   # PyTorch-style uniform init bound
        x = jax.random.normal(k1, (B, C_in, L), dtype=jnp.float32)
        w = jax.random.uniform(k2, (C_out, C_in, K), jnp.float32, -bound, bound)
        b = jax.random.uniform(k3, (C_out,), jnp.float32, -bound, bound)
        return x, w, b

    def _check(name, x, w, b, *, stride, slice_size, compute_dtype):
        out = slice_conv1d(x, w, b, stride=stride, slice_size=slice_size,
                           compute_dtype=compute_dtype)
        out = jax.block_until_ready(out)
        ref = _reference_slice_conv1d(x, w, b, stride=stride,
                                      slice_size=slice_size,
                                      compute_dtype=compute_dtype)
        assert out.shape == ref.shape, (name, out.shape, ref.shape)
        err = float(jnp.max(jnp.abs(out - ref)))
        assert jnp.allclose(out, ref, atol=2e-3, rtol=2e-3), (name, err)

    keys = jax.random.split(root, 3)

    # Config 1: Conv1d(4, 8, 5, stride=2) sliced every 16 samples (3 slices,
    # ragged last slice).  Checked with bf16 MXU inputs and the f32 escape hatch.
    x1, w1, b1 = _make(keys[0], B=2, C_in=4, C_out=8, K=5, L=40)
    _check("small-bf16", x1, w1, b1, stride=2, slice_size=16,
           compute_dtype=jnp.bfloat16)
    _check("small-f32", x1, w1, b1, stride=2, slice_size=16,
           compute_dtype=jnp.float32)

    # Config 2: longer sequence, wider output tiles, single slice group.
    x2, w2, b2 = _make(keys[1], B=2, C_in=4, C_out=16, K=5, L=800)
    _check("long", x2, w2, b2, stride=2, slice_size=300,
           compute_dtype=jnp.bfloat16)

    # Config 3: many slices (S=14 > 8) -> grouped grid with a partial last group,
    # odd slice_size exercising the begin-rounding, and B=1.
    x3, w3, b3 = _make(keys[2], B=1, C_in=3, C_out=16, K=5, L=203)
    _check("many-slices", x3, w3, b3, stride=2, slice_size=15,
           compute_dtype=jnp.bfloat16)

    print("KERNEL_OK")
</pallas_src>

<mosaic_0001>
module attributes {stable_mosaic.version = 11 : i64} {
  func.func @_slice_conv_kernel(%arg0: i32, %arg1: i32, %arg2: memref<1x3x8x9xbf16, #tpu.memory_space<vmem>>, %arg3: memref<3x8x8xbf16, #tpu.memory_space<vmem>>, %arg4: memref<8x1xf32, #tpu.memory_space<vmem>>, %arg5: memref<1x8x3x7xf32, #tpu.memory_space<vmem>>) attributes {dimension_semantics = [#tpu.dimension_semantics<parallel>, #tpu.dimension_semantics<parallel>], iteration_bounds = array<i64: 2, 1>, scalar_prefetch = 0 : i64, scratch_operands = 0 : i64, tpu.core_type = #tpu.core_type<tc>, window_params = [{transform_indices = @transform_0, window_bounds = array<i64: 1, 3, 8, 9>}, {pipeline_mode = #tpu.pipeline_mode<synchronous>, transform_indices = @transform_1, window_bounds = array<i64: 3, 8, 8>}, {pipeline_mode = #tpu.pipeline_mode<synchronous>, transform_indices = @transform_2, window_bounds = array<i64: 8, 1>}, {transform_indices = @transform_3, window_bounds = array<i64: 1, 8, 3, 7>}]} {
    %c0 = arith.constant 0 : index
    %c0_0 = arith.constant 0 : index
    %0 = vector.load %arg4[%c0, %c0_0] : memref<8x1xf32, #tpu.memory_space<vmem>>, vector<8x1xf32>
    %c0_1 = arith.constant 0 : index
    %c0_2 = arith.constant 0 : index
    %c0_3 = arith.constant 0 : index
    %c0_4 = arith.constant 0 : index
    %1 = vector.load %arg2[%c0_1, %c0_2, %c0_3, %c0_4] : memref<1x3x8x9xbf16, #tpu.memory_space<vmem>>, vector<1x1x8x9xbf16>
    %2 = vector.shape_cast %1 : vector<1x1x8x9xbf16> to vector<8x9xbf16>
    %cst = arith.constant 0.000000e+00 : f32
    %3 = vector.broadcast %cst : f32 to vector<8x7xf32>
    %c0_5 = arith.constant 0 : index
    %c0_6 = arith.constant 0 : index
    %c0_7 = arith.constant 0 : index
    %4 = vector.load %arg3[%c0_5, %c0_6, %c0_7] : memref<3x8x8xbf16, #tpu.memory_space<vmem>>, vector<1x8x8xbf16>
    %5 = vector.shape_cast %4 : vector<1x8x8xbf16> to vector<8x8xbf16>
    %6 = vector.extract_strided_slice %2 {offsets = [0, 0], sizes = [8, 7], strides = [1, 1]} : vector<8x9xbf16> to vector<8x7xbf16>
    %cst_8 = arith.constant dense<0.000000e+00> : vector<8x7xf32>
    %7 = tpu.matmul %5, %6, %cst_8 {dimension_numbers = #tpu.dot_dimension_numbers<[1], [0], [0], [1], [0, 0, 1, 1], [], []>} : vector<8x8xbf16>, vector<8x7xbf16>, vector<8x7xf32> -> vector<8x7xf32>
    %8 = arith.addf %3, %7 : vector<8x7xf32>
    %c1 = arith.constant 1 : index
    %c0_9 = arith.constant 0 : index
    %c0_10 = arith.constant 0 : index
    %9 = vector.load %arg3[%c1, %c0_9, %c0_10] : memref<3x8x8xbf16, #tpu.memory_space<vmem>>, vector<1x8x8xbf16>
    %10 = vector.shape_cast %9 : vector<1x8x8xbf16> to vector<8x8xbf16>
    %11 = vector.extract_strided_slice %2 {offsets = [0, 1], sizes = [8, 7], strides = [1, 1]} : vector<8x9xbf16> to vector<8x7xbf16>
    %cst_11 = arith.constant dense<0.000000e+00> : vector<8x7xf32>
    %12 = tpu.matmul %10, %11, %cst_11 {dimension_numbers = #tpu.dot_dimension_numbers<[1], [0], [0], [1], [0, 0, 1, 1], [], []>} : vector<8x8xbf16>, vector<8x7xbf16>, vector<8x7xf32> -> vector<8x7xf32>
    %13 = arith.addf %8, %12 : vector<8x7xf32>
    %c2 = arith.constant 2 : index
    %c0_12 = arith.constant 0 : index
    %c0_13 = arith.constant 0 : index
    %14 = vector.load %arg3[%c2, %c0_12, %c0_13] : memref<3x8x8xbf16, #tpu.memory_space<vmem>>, vector<1x8x8xbf16>
    %15 = vector.shape_cast %14 : vector<1x8x8xbf16> to vector<8x8xbf16>
    %16 = vector.extract_strided_slice %2 {offsets = [0, 2], sizes = [8, 7], strides = [1, 1]} : vector<8x9xbf16> to vector<8x7xbf16>
    %cst_14 = arith.constant dense<0.000000e+00> : vector<8x7xf32>
    %17 = tpu.matmul %15, %16, %cst_14 {dimension_numbers = #tpu.dot_dimension_numbers<[1], [0], [0], [1], [0, 0, 1, 1], [], []>} : vector<8x8xbf16>, vector<8x7xbf16>, vector<8x7xf32> -> vector<8x7xf32>
    %18 = arith.addf %13, %17 : vector<8x7xf32>
    %19 = vector.broadcast %0 : vector<8x1xf32> to vector<8x7xf32>
    %20 = arith.addf %18, %19 : vector<8x7xf32>
    %21 = vector.shape_cast %20 : vector<8x7xf32> to vector<8x1x7xf32>
    %c0_15 = arith.constant 0 : index
    %c0_16 = arith.constant 0 : index
    %c0_17 = arith.constant 0 : index
    %c0_18 = arith.constant 0 : index
    %22 = vector.load %arg5[%c0_15, %c0_16, %c0_17, %c0_18] : memref<1x8x3x7xf32, #tpu.memory_space<vmem>>, vector<1x8x1x7xf32>
    %23 = vector.shape_cast %22 : vector<1x8x1x7xf32> to vector<8x1x7xf32>
    %24 = vector.shape_cast %21 : vector<8x1x7xf32> to vector<1x8x1x7xf32>
    tpu.vector_store %arg5[%c0_15, %c0_16, %c0_17, %c0_18], %24 {strides = array<i32>} : memref<1x8x3x7xf32, #tpu.memory_space<vmem>>, vector<1x8x1x7xf32>,
    %c0_19 = arith.constant 0 : index
    %c1_20 = arith.constant 1 : index
    %c0_21 = arith.constant 0 : index
    %c0_22 = arith.constant 0 : index
    %25 = vector.load %arg2[%c0_19, %c1_20, %c0_21, %c0_22] : memref<1x3x8x9xbf16, #tpu.memory_space<vmem>>, vector<1x1x8x9xbf16>
    %26 = vector.shape_cast %25 : vector<1x1x8x9xbf16> to vector<8x9xbf16>
    %cst_23 = arith.constant 0.000000e+00 : f32
    %27 = vector.broadcast %cst_23 : f32 to vector<8x7xf32>
    %c0_24 = arith.constant 0 : index
    %c0_25 = arith.constant 0 : index
    %c0_26 = arith.constant 0 : index
    %28 = vector.load %arg3[%c0_24, %c0_25, %c0_26] : memref<3x8x8xbf16, #tpu.memory_space<vmem>>, vector<1x8x8xbf16>
    %29 = vector.shape_cast %28 : vector<1x8x8xbf16> to vector<8x8xbf16>
    %30 = vector.extract_strided_slice %26 {offsets = [0, 0], sizes = [8, 7], strides = [1, 1]} : vector<8x9xbf16> to vector<8x7xbf16>
    %cst_27 = arith.constant dense<0.000000e+00> : vector<8x7xf32>
    %31 = tpu.matmul %29, %30, %cst_27 {dimension_numbers = #tpu.dot_dimension_numbers<[1], [0], [0], [1], [0, 0, 1, 1], [], []>} : vector<8x8xbf16>, vector<8x7xbf16>, vector<8x7xf32> -> vector<8x7xf32>
    %32 = arith.addf %27, %31 : vector<8x7xf32>
    %c1_28 = arith.constant 1 : index
    %c0_29 = arith.constant 0 : index
    %c0_30 = arith.constant 0 : index
    %33 = vector.load %arg3[%c1_28, %c0_29, %c0_30] : memref<3x8x8xbf16, #tpu.memory_space<vmem>>, vector<1x8x8xbf16>
    %34 = vector.shape_cast %33 : vector<1x8x8xbf16> to vector<8x8xbf16>
    %35 = vector.extract_strided_slice %26 {offsets = [0, 1], sizes = [8, 7], strides = [1, 1]} : vector<8x9xbf16> to vector<8x7xbf16>
    %cst_31 = arith.constant dense<0.000000e+00> : vector<8x7xf32>
    %36 = tpu.matmul %34, %35, %cst_31 {dimension_numbers = #tpu.dot_dimension_numbers<[1], [0], [0], [1], [0, 0, 1, 1], [], []>} : vector<8x8xbf16>, vector<8x7xbf16>, vector<8x7xf32> -> vector<8x7xf32>
    %37 = arith.addf %32, %36 : vector<8x7xf32>
    %c2_32 = arith.constant 2 : index
    %c0_33 = arith.constant 0 : index
    %c0_34 = arith.constant 0 : index
    %38 = vector.load %arg3[%c2_32, %c0_33, %c0_34] : memref<3x8x8xbf16, #tpu.memory_space<vmem>>, vector<1x8x8xbf16>
    %39 = vector.shape_cast %38 : vector<1x8x8xbf16> to vector<8x8xbf16>
    %40 = vector.extract_strided_slice %26 {offsets = [0, 2], sizes = [8, 7], strides = [1, 1]} : vector<8x9xbf16> to vector<8x7xbf16>
    %cst_35 = arith.constant dense<0.000000e+00> : vector<8x7xf32>
    %41 = tpu.matmul %39, %40, %cst_35 {dimension_numbers = #tpu.dot_dimension_numbers<[1], [0], [0], [1], [0, 0, 1, 1], [], []>} : vector<8x8xbf16>, vector<8x7xbf16>, vector<8x7xf32> -> vector<8x7xf32>
    %42 = arith.addf %37, %41 : vector<8x7xf32>
    %43 = vector.broadcast %0 : vector<8x1xf32> to vector<8x7xf32>
    %44 = arith.addf %42, %43 : vector<8x7xf32>
    %45 = vector.shape_cast %44 : vector<8x7xf32> to vector<8x1x7xf32>
    %c0_36 = arith.constant 0 : index
    %c0_37 = arith.constant 0 : index
    %c1_38 = arith.constant 1 : index
    %c0_39 = arith.constant 0 : index
    %46 = vector.load %arg5[%c0_36, %c0_37, %c1_38, %c0_39] : memref<1x8x3x7xf32, #tpu.memory_space<vmem>>, vector<1x8x1x7xf32>
    %47 = vector.shape_cast %46 : vector<1x8x1x7xf32> to vector<8x1x7xf32>
    %48 = vector.shape_cast %45 : vector<8x1x7xf32> to vector<1x8x1x7xf32>
    tpu.vector_store %arg5[%c0_36, %c0_37, %c1_38, %c0_39], %48 {strides = array<i32>} : memref<1x8x3x7xf32, #tpu.memory_space<vmem>>, vector<1x8x1x7xf32>,
    %c0_40 = arith.constant 0 : index
    %c2_41 = arith.constant 2 : index
    %c0_42 = arith.constant 0 : index
    %c0_43 = arith.constant 0 : index
    %49 = vector.load %arg2[%c0_40, %c2_41, %c0_42, %c0_43] : memref<1x3x8x9xbf16, #tpu.memory_space<vmem>>, vector<1x1x8x9xbf16>
    %50 = vector.shape_cast %49 : vector<1x1x8x9xbf16> to vector<8x9xbf16>
    %cst_44 = arith.constant 0.000000e+00 : f32
    %51 = vector.broadcast %cst_44 : f32 to vector<8x7xf32>
    %c0_45 = arith.constant 0 : index
    %c0_46 = arith.constant 0 : index
    %c0_47 = arith.constant 0 : index
    %52 = vector.load %arg3[%c0_45, %c0_46, %c0_47] : memref<3x8x8xbf16, #tpu.memory_space<vmem>>, vector<1x8x8xbf16>
    %53 = vector.shape_cast %52 : vector<1x8x8xbf16> to vector<8x8xbf16>
    %54 = vector.extract_strided_slice %50 {offsets = [0, 0], sizes = [8, 7], strides = [1, 1]} : vector<8x9xbf16> to vector<8x7xbf16>
    %cst_48 = arith.constant dense<0.000000e+00> : vector<8x7xf32>
    %55 = tpu.matmul %53, %54, %cst_48 {dimension_numbers = #tpu.dot_dimension_numbers<[1], [0], [0], [1], [0, 0, 1, 1], [], []>} : vector<8x8xbf16>, vector<8x7xbf16>, vector<8x7xf32> -> vector<8x7xf32>
    %56 = arith.addf %51, %55 : vector<8x7xf32>
    %c1_49 = arith.constant 1 : index
    %c0_50 = arith.constant 0 : index
    %c0_51 = arith.constant 0 : index
    %57 = vector.load %arg3[%c1_49, %c0_50, %c0_51] : memref<3x8x8xbf16, #tpu.memory_space<vmem>>, vector<1x8x8xbf16>
    %58 = vector.shape_cast %57 : vector<1x8x8xbf16> to vector<8x8xbf16>
    %59 = vector.extract_strided_slice %50 {offsets = [0, 1], sizes = [8, 7], strides = [1, 1]} : vector<8x9xbf16> to vector<8x7xbf16>
    %cst_52 = arith.constant dense<0.000000e+00> : vector<8x7xf32>
    %60 = tpu.matmul %58, %59, %cst_52 {dimension_numbers = #tpu.dot_dimension_numbers<[1], [0], [0], [1], [0, 0, 1, 1], [], []>} : vector<8x8xbf16>, vector<8x7xbf16>, vector<8x7xf32> -> vector<8x7xf32>
    %61 = arith.addf %56, %60 : vector<8x7xf32>
    %c2_53 = arith.constant 2 : index
    %c0_54 = arith.constant 0 : index
    %c0_55 = arith.constant 0 : index
    %62 = vector.load %arg3[%c2_53, %c0_54, %c0_55] : memref<3x8x8xbf16, #tpu.memory_space<vmem>>, vector<1x8x8xbf16>
    %63 = vector.shape_cast %62 : vector<1x8x8xbf16> to vector<8x8xbf16>
    %64 = vector.extract_strided_slice %50 {offsets = [0, 2], sizes = [8, 7], strides = [1, 1]} : vector<8x9xbf16> to vector<8x7xbf16>
    %cst_56 = arith.constant dense<0.000000e+00> : vector<8x7xf32>
    %65 = tpu.matmul %63, %64, %cst_56 {dimension_numbers = #tpu.dot_dimension_numbers<[1], [0], [0], [1], [0, 0, 1, 1], [], []>} : vector<8x8xbf16>, vector<8x7xbf16>, vector<8x7xf32> -> vector<8x7xf32>
    %66 = arith.addf %61, %65 : vector<8x7xf32>
    %67 = vector.broadcast %0 : vector<8x1xf32> to vector<8x7xf32>
    %68 = arith.addf %66, %67 : vector<8x7xf32>
    %69 = vector.shape_cast %68 : vector<8x7xf32> to vector<8x1x7xf32>
    %c0_57 = arith.constant 0 : index
    %c0_58 = arith.constant 0 : index
    %c2_59 = arith.constant 2 : index
    %c0_60 = arith.constant 0 : index
    %70 = vector.load %arg5[%c0_57, %c0_58, %c2_59, %c0_60] : memref<1x8x3x7xf32, #tpu.memory_space<vmem>>, vector<1x8x1x7xf32>
    %71 = vector.shape_cast %70 : vector<1x8x1x7xf32> to vector<8x1x7xf32>
    %72 = vector.shape_cast %69 : vector<8x1x7xf32> to vector<1x8x1x7xf32>
    tpu.vector_store %arg5[%c0_57, %c0_58, %c2_59, %c0_60], %72 {strides = array<i32>} : memref<1x8x3x7xf32, #tpu.memory_space<vmem>>, vector<1x8x1x7xf32>,
    return
  }
  func.func @transform_0(%arg0: i32, %arg1: i32) -> (i32, i32, i32, i32) {
    %c0_i32 = arith.constant 0 : i32
    %c0_i32_0 = arith.constant 0 : i32
    %c0_i32_1 = arith.constant 0 : i32
    return %arg0, %arg1, %c0_i32, %c0_i32_0 : i32, i32, i32, i32
  }
  func.func @transform_1(%arg0: i32, %arg1: i32) -> (i32, i32, i32) {
    %c0_i32 = arith.constant 0 : i32
    %c0_i32_0 = arith.constant 0 : i32
    %c0_i32_1 = arith.constant 0 : i32
    %c0_i32_2 = arith.constant 0 : i32
    return %c0_i32, %c0_i32_0, %c0_i32_1 : i32, i32, i32
  }
  func.func @transform_2(%arg0: i32, %arg1: i32) -> (i32, i32) {
    %c0_i32 = arith.constant 0 : i32
    %c0_i32_0 = arith.constant 0 : i32
    %c0_i32_1 = arith.constant 0 : i32
    return %c0_i32, %c0_i32_0 : i32, i32
  }
  func.func @transform_3(%arg0: i32, %arg1: i32) -> (i32, i32, i32, i32) {
    %c0_i32 = arith.constant 0 : i32
    %c0_i32_0 = arith.constant 0 : i32
    %c0_i32_1 = arith.constant 0 : i32
    return %arg0, %c0_i32, %arg1, %c0_i32_0 : i32, i32, i32, i32
  }
}

</mosaic_0001>

<bundles_post_ra>
// kernel: tpu_custom_call.1
= control target key start
LH: loop header
LB: loop body
LE: loop exit
PB: predicated region body
PF: predicated region fallthrough
CT: control target
= control target key end

     0   :  { %8 = vsyncpa [#allocation3], 0  ;;  %s1525_s0 = inlined_call_operand.hbm [shape: bf16[2,3,8,9], index: 0, kind: input, shape index: {}]   ;;  %s1526_s1 = inlined_call_operand.vmem [shape: bf16[3,8,8], index: 1, kind: input, shape index: {}]   ;;  %s1527_s2 = inlined_call_operand.vmem [shape: f32[8,1], index: 2, kind: input, shape index: {}]   ;;  %s1528_s3 = inlined_call_operand.vmem [shape: f32[2,8,3,7], index: 3, kind: output, shape index: {}]  }
   0x1   :  { %10 = vsyncpa [#allocation3 + $0x1], 0  ;;  %s1257_s12 = smov 0   ;;  %s1259_s13 = smov 0  }
   0x2   :  { %s1261_s14 = smov 0   ;;  %s1263_s15 = smov 0  }
   0x3   :  { %s1265_s16 = smov 0   ;;  %s1267_s17 = smov 0  }
   0x4 LB: > { %s973_s18 = sadd.s32 4294967295, %s1226_s17   ;;  %s28_s19 = sadd.s32 1, %s1222_s16  ;;  %s1226_s17 = sphi %s1267_s17, %s16_s17   ;;  %s1222_s16 = sphi %s1265_s16, %s1535_s16   ;;  %s1218_s15 = sphi %s1263_s15, %s1534_s15   ;;  %s1214_s14 = sphi %s1261_s14, %s1533_s14   ;;  %s1210_s13 = sphi %s1259_s13, %s1532_s13   ;;  %s1206_s12 = sphi %s1257_s12, %s1531_s12  }
   0x5   : > { %p30_p0 = scmp.ge.s32.totalorder %s28_s19, 2  ;;  %s37_s20 = sadd.s32 1, %s1214_s14 }
   0x6   : > { %p44_p1 = scmp.ne.s32.totalorder %s1214_s14, %s1210_s13  ;;  %p45_p2 = scmp.eq.s32.totalorder %s1226_s17, 0 }
   0x7   : > { %s1537_s19 = smov (%p30_p0, %s28_s19), 0  ;;  %p50_p4 = scmp.ne.s32.totalorder %s1210_s13, %s1206_s12 }
   0x8   : > { %p46_p3 = por %p45_p2, %p44_p1  ;;  %s32_s21 = ssub.s32 %s1222_s16, %s1537_s19 }
   0x9   : > { %p51_p5 = scmp.eq.s32.totalorder %s973_s18, 0  ;;  %p35_p6 = scmp.eq.s32.totalorder %s32_s21, 0 }
   0xa   : > { %p1085_p8 = scmp.lt.s32.totalorder %s1226_s17, 2  ;;  %s150_s24 = sand.u32 1, %s1214_s14  }
   0xb   : > { %p1296_p7 = por %p51_p5, %p50_p4  ;;  %s1077_s25 = smul.u32 192, %s1222_s16 }
   0xc   : > { %s1302_s23 = scalar_select %p35_p6, %s1214_s14, %s37_s20  }
   0xd   : > { %s1076_s26 = smul.u32 12, %s150_s24  ;;  %s1309_s29 = scalar_lea.hbm %s1525_s0, %s1077_s25 }
   0xe   : > { %p1311_p9 = pnand %p1085_p8, %p46_p3  ;;  %s1317_s6 = scalar_lea.sflag [#allocation3], %s150_s24 }
   0xf   : > { %s154_s4 = scalar_lea.vmem [#allocation2], %s1076_s26  ;;  %s1146_s7 = scalar_lea.hbm %s1309_s29, 192 }
  0x10   : > { %s163_s5 = sshll.u32 %s154_s4, 4  ;;  %p1147_p10 = scmp.ne.s32.totalorder %s1309_s29, %s1146_s7  ;;  %s1315_s5 = int_to_ptr.vmem [resolvable:$true] %s163_s5 }
  0x11   : > { %p1148_p11 = pneg %p1311_p9  ;;  %s1151_s10 = scalar_lea.hbm %s1525_s0, 384 }
  0x12   : > { %p1152_p0 = scmp.lt.u32.totalorder %s1309_s29, %s1525_s0  ;;  %p1153_p1 = scmp.lt.u32.totalorder %s1151_s10, %s1146_s7 }
  0x13   : > { %p1149_p12 = pnand %p1148_p11, %p1147_p10  ;;  %p1155_p3 = scmp.lt.u32.totalorder %s1146_s7, %s1309_s29 }
  0x14   : > { %p1154_p2 = por %p1153_p1, %p1152_p0 }
  0x15   : > { %p1150_p13 = pneg %p1149_p12 }
  0x16   : > { %p1156_p4 = por %p1155_p3, %p1154_p2 }
  0x18   : > { %p1157_p5 = pnand %p1156_p4, %p1150_p13 }
  0x1a   : > { %1160 = shalt.err (!%p1157_p5)
}
  0x1b   : > { %s1161_s18 = scalar_lea.vmem %s1315_s5, 192  ;;  %s1228_s20 = smov [#allocation2]  }
  0x1c   : > { %p1162_p6 = scmp.ne.s32.totalorder %s1315_s5, %s1161_s18  ;;  %s1166_s21 = sshll.u32 %s1228_s20, 4  ;;  %s1167_s21 = int_to_ptr.vmem [resolvable:$false] %s1166_s21 }
  0x1d   : > { %s1168_s24 = scalar_lea.vmem %s1167_s21, 384  ;;  %p1169_p12 = scmp.lt.s32.totalorder %s1315_s5, %s1167_s21 }
  0x1e   : > { %p1164_p8 = pnand %p1162_p6, %p1148_p11  ;;  %p1170_p0 = scmp.lt.s32.totalorder %s1168_s24, %s1161_s18 }
  0x20   : > { %p1165_p10 = pneg %p1164_p8  ;;  %p1171_p1 = por %p1170_p0, %p1169_p12 }
  0x22   : > { %p1172_p2 = pnand %p1171_p1, %p1165_p10 }
  0x24   : > { %1175 = shalt.err (!%p1172_p2)
}
  0x25   : > { %s1229_s25 = smov 64   ;;  %s1230_s26 = smov 4  }
  0x26   : > { %1084 = dma.hbm_to_vmem [thread:$0]  (!%p1311_p9), %s1309_s29, 192, %s1315_s5, %s1317_s6, %s1229_s25, %s1229_s25, %s1230_s26  }
  0x27   : > { %p978_p11 = scmp.ge.s32.totalorder %s1226_s17, 1  ;;  %p171_p13 = scmp.lt.s32.totalorder %s1226_s17, 3 }
  0x29   : > { %p172_p3 = pnand %p978_p11, %p171_p13 }
  0x2a   : > { %s177_s27 = sand.u32 (!%p172_p3), 1, %s1210_s13  }
  0x2b   : > { %175 = sbr.rel (%p172_p3) target bundleno = 432 (0x1b0), region = 32  ;;  %s178_s4 = scalar_lea.sflag (!%p172_p3), [#allocation3], %s177_s27 }
  0x2c   : > { %s1078_s28 = smul.u32 (!%p172_p3), 12, %s177_s27 }
  0x2e   : > { %s181_s7 = scalar_lea.vmem (!%p172_p3), [#allocation2], %s1078_s28 }
  0x32   : > { %1201 = dma.done.wait (%p1296_p7), %s178_s4, 192  }
  0x33   : > { %1203 = vsyncadd (%p1296_p7), %s178_s4, 4294967104  ;;  %v1231_v0 = vmov 0.0   ;;  %vm1232_vm0 = vmmov 0   ;;  %vm231_vm1 = vcmask 1043456   ;;  %v218_v1 = vld [vmem:[%s181_s7] sm:$0xf]  ;;  %v383_v43 = vlaneseq }
  0x34   : > { %1022 = vmatprep.subr.bf16.mxu0 %v1231_v0  ;;  %1028 = vmatprep.subr.bf16.mxu1 %v1231_v0  ;;  %v987_v2 = vld [vmem:[%s181_s7 + $0x4] sm:$0xf]  ;;  %v982_v3 = vcombine.low %v218_v1, %v218_v1  ;;  %v279_v5 = vsel %vm231_vm1, %v218_v1, 0  ;;  %vm227_vm2 = vcmask 64512   ;;  %v219_v6 = vld [vmem:[%s1526_s1] sm:$0xf] }
  0x35   : > { %1024 = vmatprep.mubr.msk.bf16.mxu0 %vm1232_vm0, %v1231_v0  ;;  %1030 = vmatprep.mubr.msk.bf16.mxu1 %vm1232_vm0, %v1231_v0  ;;  %v989_v4 = vcombine.low %v987_v2, %v987_v2  ;;  %s1233_s30 = smov 127   ;;  %v994_v7 = vld [vmem:[%s181_s7 + $0x8] sm:$0xf]  ;;  %s1234_s5 = smov 126   ;;  %v217_v9 = vld [vmem:[%s1527_s2] sm:$0xff]  ;;  %v1235_v10 = vmov 0  }
  0x36   : > { %1029 = vmatpush3.bf16.msra.mxu1 %v279_v5  ;;  %225 = vrot.lane.b32.xlu0 %v982_v3, %s1233_s30  ;;  %v996_v8 = vcombine.low %v994_v7, %v994_v7  ;;  %v981_v15 = vld [vmem:[%s1526_s1 + $0x4] sm:$0xf]  ;;  %v985_v21 = vld [vmem:[%s1526_s1 + $0x8] sm:$0xf]  ;;  %v504_v23 = vsel %vm231_vm1, %v987_v2, 0  ;;  %v722_v24 = vsel %vm231_vm1, %v994_v7, 0 }
  0x37   : > { %452 = vrot.lane.b32.xlu1 %v989_v4, %s1233_s30  ;;  %1040 = vmatprep.subr.bf16.mxu1 %v1231_v0  ;;  %v988_v16 = vld [vmem:[%s1526_s1 + $0x4] sm:$0xf]  ;;  %v992_v22 = vld [vmem:[%s1526_s1 + $0x8] sm:$0xf]  ;;  %v447_v26 = vld [vmem:[%s1526_s1] sm:$0xf] }
  0x38   : > { %1142 = vset.pattern.permute.xlu0 %v1235_v10  ;;  %v665_v27 = vld [vmem:[%s1526_s1] sm:$0xf]  ;;  %v995_v30 = vld [vmem:[%s1526_s1 + $0x4] sm:$0xf]  ;;  %v999_v32 = vld [vmem:[%s1526_s1 + $0x8] sm:$0xf] }
  0x39   : > { %1031 = vmatmul.mubr.msk.bf16.vlgmr.msra.gmra.mrb[0].mxu1 %vm227_vm2, %v219_v6  ;;  %v1236_v41 = vmov 1966171168   ;;  %p208_p7 = scmp.lt.s32.totalorder %s1218_s15, 1  ;;  %v384_v50 = vshrl.u32 %v383_v43, 7  ;;  %vm436_vm3 = vcmask 49152  }
  0x3a   : > { %1042 = vmatprep.mubr.msk.bf16.mxu1 %vm1232_vm0, %v1231_v0  ;;  %323 = vrot.lane.b32.xlu0 %v982_v3, %s1234_s5  ;;  %v381_v42 = vunpack.c.l.s4 %v1236_v41 }
  0x3b   : > { %547 = vrot.lane.b32.xlu1 %v989_v4, %s1234_s5  ;;  %s1539_s15 = smov (!%p208_p7, %s1218_s15), 1 }
  0x3c   : > { %v382_v49 = vunpack.c.0.s8 %v381_v42 }
  0x3e   : > { %670 = vrot.lane.b32.xlu0 %v996_v8, %s1233_s30  ;;  %v1431_v56 = vsub.s32 %v382_v49, %v384_v50  ;;  %s1003_s30 = sshll.u32 %s1539_s15, 5 }
  0x3f   : > { %765 = vrot.lane.b32.xlu1 %v996_v8, %s1234_s5  ;;  %s1438_s8 = scalar_lea.vmem %s1528_s3, %s1003_s30 }
  0x42   : > { %374 = vperm.xlu0 %1142, %v217_v9  }
  0xa8   : > { %v226_v11 = vpop.permute.xlu0 %225 }
  0xa9   : > { %v453_v12 = vpop.permute.xlu1 %452  ;;  %v233_v13 = vsel %vm231_vm1, %v226_v11, 0 }
  0xaa   : > { %v458_v14 = vsel %vm231_vm1, %v453_v12, 0  ;;  %1023 = vmatpush3.bf16.msra.mxu0 %v233_v13 }
  0xab   : > { %1041 = vmatpush3.bf16.msra.mxu1 %v458_v14  ;;  %1034 = vmatprep.subr.bf16.mxu0 %v1231_v0 }
  0xac   : > { %1052 = vmatprep.subr.bf16.mxu1 %v1231_v0  ;;  %v324_v17 = vpop.permute.xlu0 %323 }
  0xad   : > { %v548_v18 = vpop.permute.xlu1 %547  ;;  %v329_v19 = vsel %vm231_vm1, %v324_v17, 0  ;;  %1025 = vmatmul.mubr.msk.bf16.vlgmr.msra.gmra.mrb[0].mxu0 %vm227_vm2, %v981_v15 }
  0xae   : > { %1043 = vmatmul.mubr.msk.bf16.vlgmr.msra.gmra.mrb[4].mxu1 %vm227_vm2, %v988_v16  ;;  %v553_v20 = vsel %vm231_vm1, %v548_v18, 0  ;;  %1035 = vmatpush3.bf16.msra.mxu0 %v329_v19 }
  0xaf   : > { %1036 = vmatprep.mubr.msk.bf16.mxu0 %vm1232_vm0, %v1231_v0  ;;  %1046 = vmatprep.subr.bf16.mxu0 %v1231_v0 }
  0xb0   : > { %1053 = vmatpush3.bf16.msra.mxu1 %v553_v20  ;;  %1054 = vmatprep.mubr.msk.bf16.mxu1 %vm1232_vm0, %v1231_v0  ;;  %v671_v25 = vpop.permute.xlu0 %670 }
  0xb1   : > { %1064 = vmatprep.subr.bf16.mxu1 %v1231_v0  ;;  %v676_v28 = vsel %vm231_vm1, %v671_v25, 0  ;;  %v766_v29 = vpop.permute.xlu1 %765 }
  0xb2   : > { %v771_v31 = vsel %vm231_vm1, %v766_v29, 0 }
  0xb5   : > { %1037 = vmatmul.mubr.msk.bf16.vlgmr.msra.gmra.mrb[4].mxu0 %vm227_vm2, %v985_v21 }
  0xb6   : > { %1055 = vmatmul.mubr.msk.bf16.vlgmr.msra.gmra.mrb[8].mxu1 %vm227_vm2, %v992_v22  ;;  %1047 = vmatpush3.bf16.msra.mxu0 %v504_v23 }
  0xb7   : > { %1048 = vmatprep.mubr.msk.bf16.mxu0 %vm1232_vm0, %v1231_v0  ;;  %1058 = vmatprep.subr.bf16.mxu0 %v1231_v0 }
  0xb8   : > { %1065 = vmatpush3.bf16.msra.mxu1 %v722_v24  ;;  %1066 = vmatprep.mubr.msk.bf16.mxu1 %vm1232_vm0, %v1231_v0 }
  0xbd   : > { %1049 = vmatmul.mubr.msk.bf16.vlgmr.msra.gmra.mrb[8].mxu0 %vm227_vm2, %v447_v26 }
  0xbe   : > { %1067 = vmatmul.mubr.msk.bf16.vlgmr.msra.gmra.mrb[12].mxu1 %vm227_vm2, %v665_v27  ;;  %1059 = vmatpush3.bf16.msra.mxu0 %v676_v28 }
  0xbf   : > { %1060 = vmatprep.mubr.msk.bf16.mxu0 %vm1232_vm0, %v1231_v0  ;;  %1070 = vmatprep.subr.bf16.mxu0 %v1231_v0 }
  0xc1   : > { %v1429_v51 = vpop.permute.xlu0 %374 }
  0xc5   : > { %1061 = vmatmul.mubr.msk.bf16.vlgmr.msra.gmra.mrb[12].mxu0 %vm227_vm2, %v995_v30 }
  0xc6   : > { %1071 = vmatpush3.bf16.msra.mxu0 %v771_v31  ;;  %1072 = vmatprep.mubr.msk.bf16.mxu0 %vm1232_vm0, %v1231_v0 }
  0xcd   : > { %1073 = vmatmul.mubr.msk.bf16.vlgmr.msra.gmra.mrb[16].mxu0 %vm227_vm2, %v999_v32 }
 0x10c   : > { %v315_v33 = vpop.f32.mrb[0].mxu1 }
 0x10d   : > { %v1032_v34 = vpop.f32.mrb[1].mxu1 }
 0x10e   : > { %v318_v35 = vpop.f32.mrb[2].mxu1 }
 0x10f   : > { %v1033_v36 = vpop.f32.mrb[3].mxu1 }
 0x180   : > { %v269_v37 = vpop.f32.mrb[0].mxu0 }
 0x181   : > { %v494_v38 = vpop.f32.mrb[4].mxu1  ;;  %v1026_v39 = vpop.f32.mrb[1].mxu0  ;;  %v316_v40 = vadd.f32 %v315_v33, %v269_v37 }
 0x182   : > { %v1044_v44 = vpop.f32.mrb[5].mxu1  ;;  %v272_v45 = vpop.f32.mrb[2].mxu0 }
 0x183   : > { %v497_v46 = vpop.f32.mrb[6].mxu1  ;;  %v1027_v47 = vpop.f32.mrb[3].mxu0 }
 0x184   : > { %v1045_v48 = vpop.f32.mrb[7].mxu1 }
 0x188   : > { %v365_v52 = vpop.f32.mrb[4].mxu0 }
 0x189   : > { %v589_v53 = vpop.f32.mrb[8].mxu1  ;;  %v371_v54 = vadd.f32 %v365_v52, %v316_v40  ;;  %v1038_v55 = vpop.f32.mrb[5].mxu0 }
 0x18a   : > { %v1056_v57 = vpop.f32.mrb[9].mxu1  ;;  %v368_v58 = vpop.f32.mrb[6].mxu0 }
 0x18b   : > { %v592_v59 = vpop.f32.mrb[10].mxu1  ;;  %v377_v60 = vadd.f32 %v1429_v51, %v371_v54  ;;  %v1039_v61 = vpop.f32.mrb[7].mxu0 }
 0x18c   : > { %v1057_v62 = vpop.f32.mrb[11].mxu1 }
 0x18d   : > { %v379_v63 = vcombine.high %v377_v60, %v377_v60  ;;  %v386_v0 = vrot.slane %v377_v60, %v1431_v56 }
 0x18f   : > { %v393_v1 = vrot.slane %v379_v63, %v1431_v56  ;;  %v394_v2 = vcombine.high %v386_v0, %v386_v0  ;;  %v402_v3 = vrot.slane %v386_v0, %v1431_v56 }
 0x190   : > { %v540_v4 = vpop.f32.mrb[8].mxu0 }
 0x191   : > { %v758_v5 = vpop.f32.mrb[12].mxu1  ;;  %v395_v6 = vcombine.high %v393_v1, %v393_v1  ;;  %v409_v7 = vrot.slane %v393_v1, %v1431_v56  ;;  %v416_v8 = vrot.slane %v394_v2, %v1431_v56  ;;  %v424_v9 = vcombine.high %v402_v3, %v402_v3  ;;  %437 = vst.msk [vmem:[%s1438_s8] sm:$0x1] %vm436_vm3, %v402_v3  ;;  %v1050_v10 = vpop.f32.mrb[9].mxu0 }
 0x192   : > { %v1068_v11 = vpop.f32.mrb[13].mxu1  ;;  %v541_v12 = vadd.f32 %v540_v4, %v494_v38  ;;  %v543_v13 = vpop.f32.mrb[10].mxu0 }
 0x193   : > { %v761_v14 = vpop.f32.mrb[14].mxu1  ;;  %v423_v15 = vrot.slane %v395_v6, %v1431_v56  ;;  %v425_v16 = vcombine.high %v409_v7, %v409_v7  ;;  %v426_v17 = vcombine.high %v416_v8, %v416_v8  ;;  %438 = vst.msk [vmem:[%s1438_s8 + $0x4] sm:$0x1] %vm436_vm3, %v416_v8  ;;  %439 = vst.msk [vmem:[%s1438_s8 + $0x8] sm:$0x1] %vm436_vm3, %v424_v9  ;;  %v1051_v18 = vpop.f32.mrb[11].mxu0 }
 0x194   : > { %441 = vst.msk [vmem:[%s1438_s8 + $0x10] sm:$0x1] %vm436_vm3, %v409_v7  ;;  %v1069_v19 = vpop.f32.mrb[15].mxu1  ;;  %v595_v20 = vadd.f32 %v589_v53, %v541_v12 }
 0x195   : > { %v427_v21 = vcombine.high %v423_v15, %v423_v15  ;;  %440 = vst.msk [vmem:[%s1438_s8 + $0xc] sm:$0x1] %vm436_vm3, %v426_v17  ;;  %442 = vst.msk [vmem:[%s1438_s8 + $0x14] sm:$0x1] %vm436_vm3, %v423_v15 }
 0x196   : > { %443 = vst.msk [vmem:[%s1438_s8 + $0x18] sm:$0x1] %vm436_vm3, %v425_v16  ;;  %v596_v22 = vadd.f32 %v595_v20, %v1429_v51 }
 0x197   : > { %444 = vst.msk [vmem:[%s1438_s8 + $0x1c] sm:$0x1] %vm436_vm3, %v427_v21 }
 0x198   : > { %v598_v23 = vcombine.high %v596_v22, %v596_v22  ;;  %v605_v24 = vrot.slane %v596_v22, %v1431_v56  ;;  %v712_v25 = vpop.f32.mrb[12].mxu0 }
 0x199   : > { %v1062_v26 = vpop.f32.mrb[13].mxu0  ;;  %v759_v27 = vadd.f32 %v758_v5, %v712_v25 }
 0x19a   : > { %v612_v28 = vrot.slane %v598_v23, %v1431_v56  ;;  %v613_v29 = vcombine.high %v605_v24, %v605_v24  ;;  %v621_v30 = vrot.slane %v605_v24, %v1431_v56  ;;  %v715_v31 = vpop.f32.mrb[14].mxu0 }
 0x19b   : > { %v1063_v32 = vpop.f32.mrb[15].mxu0 }
 0x19c   : > { %v614_v33 = vcombine.high %v612_v28, %v612_v28  ;;  %v628_v34 = vrot.slane %v612_v28, %v1431_v56  ;;  %v635_v35 = vrot.slane %v613_v29, %v1431_v56  ;;  %v643_v36 = vcombine.high %v621_v30, %v621_v30  ;;  %655 = vst.msk [vmem:[%s1438_s8 + $0x1] sm:$0x1] %vm436_vm3, %v621_v30 }
 0x19e   : > { %v642_v37 = vrot.slane %v614_v33, %v1431_v56  ;;  %v644_v38 = vcombine.high %v628_v34, %v628_v34  ;;  %v645_v39 = vcombine.high %v635_v35, %v635_v35  ;;  %656 = vst.msk [vmem:[%s1438_s8 + $0x5] sm:$0x1] %vm436_vm3, %v635_v35  ;;  %657 = vst.msk [vmem:[%s1438_s8 + $0x9] sm:$0x1] %vm436_vm3, %v643_v36 }
 0x19f   : > { %659 = vst.msk [vmem:[%s1438_s8 + $0x11] sm:$0x1] %vm436_vm3, %v628_v34 }
 0x1a0   : > { %v646_v40 = vcombine.high %v642_v37, %v642_v37  ;;  %658 = vst.msk [vmem:[%s1438_s8 + $0xd] sm:$0x1] %vm436_vm3, %v645_v39  ;;  %660 = vst.msk [vmem:[%s1438_s8 + $0x15] sm:$0x1] %vm436_vm3, %v642_v37  ;;  %v807_v41 = vpop.f32.mrb[16].mxu0 }
 0x1a1   : > { %661 = vst.msk [vmem:[%s1438_s8 + $0x19] sm:$0x1] %vm436_vm3, %v644_v38  ;;  %v813_v42 = vadd.f32 %v807_v41, %v759_v27  ;;  %v1074_v43 = vpop.f32.mrb[17].mxu0 }
 0x1a2   : > { %662 = vst.msk [vmem:[%s1438_s8 + $0x1d] sm:$0x1] %vm436_vm3, %v646_v40  ;;  %v810_v44 = vpop.f32.mrb[18].mxu0 }
 0x1a3   : > { %v814_v45 = vadd.f32 %v813_v42, %v1429_v51  ;;  %v1075_v46 = vpop.f32.mrb[19].mxu0 }
 0x1a5   : > { %v816_v47 = vcombine.high %v814_v45, %v814_v45  ;;  %v823_v48 = vrot.slane %v814_v45, %v1431_v56 }
 0x1a7   : > { %v830_v49 = vrot.slane %v816_v47, %v1431_v56  ;;  %v831_v50 = vcombine.high %v823_v48, %v823_v48  ;;  %v839_v52 = vrot.slane %v823_v48, %v1431_v56 }
 0x1a9   : > { %v832_v53 = vcombine.high %v830_v49, %v830_v49  ;;  %v846_v54 = vrot.slane %v830_v49, %v1431_v56  ;;  %v853_v51 = vrot.slane %v831_v50, %v1431_v56  ;;  %v861_v55 = vcombine.high %v839_v52, %v839_v52  ;;  %873 = vst.msk [vmem:[%s1438_s8 + $0x2] sm:$0x1] %vm436_vm3, %v839_v52 }
 0x1ab   : > { %v860_v57 = vrot.slane %v832_v53, %v1431_v56  ;;  %v862_v58 = vcombine.high %v846_v54, %v846_v54  ;;  %v863_v59 = vcombine.high %v853_v51, %v853_v51  ;;  %874 = vst.msk [vmem:[%s1438_s8 + $0x6] sm:$0x1] %vm436_vm3, %v853_v51  ;;  %875 = vst.msk [vmem:[%s1438_s8 + $0xa] sm:$0x1] %vm436_vm3, %v861_v55 }
 0x1ac   : > { %877 = vst.msk [vmem:[%s1438_s8 + $0x12] sm:$0x1] %vm436_vm3, %v846_v54 }
 0x1ad   : > { %v864_v60 = vcombine.high %v860_v57, %v860_v57  ;;  %876 = vst.msk [vmem:[%s1438_s8 + $0xe] sm:$0x1] %vm436_vm3, %v863_v59  ;;  %878 = vst.msk [vmem:[%s1438_s8 + $0x16] sm:$0x1] %vm436_vm3, %v860_v57 }
 0x1ae   : > { %879 = vst.msk [vmem:[%s1438_s8 + $0x1a] sm:$0x1] %vm436_vm3, %v862_v58 }
 0x1af   : > { %880 = vst.msk [vmem:[%s1438_s8 + $0x1e] sm:$0x1] %vm436_vm3, %v864_v60 }
 0x1b0 PF: > { %s16_s17 = sadd.s32 1, %s1226_s17   ;;  %s1531_s12 = smov %s1210_s13 }
 0x1b1   : > { %p13_p9 = scmp.ge.s32.totalorder %s16_s17, 4   ;;  %s1532_s13 = smov %s1214_s14 }
 0x1b2   : > { %s1533_s14 = smov %s1302_s23  ;;  %s1534_s15 = smov %s1222_s16 }
 0x1b3   : > { %s1535_s16 = smov %s1537_s19  ;;  %15 = sbr.rel (!%p13_p9) target bundleno = 4 (0x4), region = 76 }
 0x1ba   :  { %908 = vsyncpa [#allocation3], 1 }
 0x1bb   :  { %910 = vsyncpa [#allocation3 + $0x1], 1 }

</bundles_post_ra>
